<compile_context>
chip_gen: v7x
topology: tpu7x:2x2x1
jax: 0.10.0
libtpu: 0.0.40
codegen_flags: <defaults>
</compile_context>

<pallas_src>
import functools

import jax
import jax.numpy as jnp
from jax.experimental import pallas as pl
from jax.experimental.pallas import tpu as pltpu


def logreg_kernel(x_ref, w_ref, b_ref, o_ref):
    # x_ref: [F, TILE_N] VMEM (feature-major: N on lanes)
    # w_ref: [F]   SMEM scalars
    # b_ref: [1]   SMEM scalar
    # o_ref: [1, TILE_N] VMEM (lane-dense output)
    x = x_ref[...].astype(jnp.float32)          # [F, TILE_N]
    f = x.shape[0]
    z = x[0:1, :] * w_ref[0]                    # [1, TILE_N] VPU FMA
    for k in range(1, f):                       # static unroll (F == 2)
        z = z + x[k:k + 1, :] * w_ref[k]
    z = z + b_ref[0]
    o_ref[...] = jax.nn.sigmoid(z).astype(o_ref.dtype)  # EUP exp, free slot


@functools.partial(jax.jit, static_argnames=("tile_n",))
def logistic_regression(x, weight, bias, *, tile_n=2048):
    """x: [N, 2], weight: [1, 2], bias: [1] -> [N, 1] (same dtype as x)."""
    n, f = x.shape

    # Lane-dense padding: at least a multiple of 128; tile over N if large.
    n_pad = pl.cdiv(n, 128) * 128
    if n_pad <= tile_n:
        tile = n_pad
    else:
        tile = tile_n
        n_pad = pl.cdiv(n, tile) * tile
    num_tiles = n_pad // tile

    # Feature-major, zero-padded (padding rows produce sigmoid(b); sliced off).
    x_t = jnp.pad(x.T, ((0, 0), (0, n_pad - n)))          # [F, n_pad]
    w_flat = weight.reshape(f).astype(jnp.float32)         # [F] -> SMEM
    b_flat = bias.reshape(1).astype(jnp.float32)            # [1] -> SMEM

    y_flat = pl.pallas_call(
        logreg_kernel,
        out_shape=jax.ShapeDtypeStruct((1, n_pad), x.dtype),
        grid=(num_tiles,),
        in_specs=[
            pl.BlockSpec((f, tile), lambda i: (0, i)),
            pl.BlockSpec(memory_space=pltpu.MemorySpace.SMEM),
            pl.BlockSpec(memory_space=pltpu.MemorySpace.SMEM),
        ],
        out_specs=pl.BlockSpec((1, tile), lambda i: (0, i)),
        compiler_params=pltpu.CompilerParams(
            dimension_semantics=("parallel",),
        ),
    )(x_t, w_flat, b_flat)

    return y_flat[0, :n].reshape(n, 1)


if __name__ == "__main__":
    key = jax.random.PRNGKey(0)
    kx, kw, kb = jax.random.split(key, 3)

    N, F = 8, 2
    x = jax.random.normal(kx, (N, F), dtype=jnp.float32)
    # nn.Linear(2, 1) param shapes: W [1, 2], b [1]
    weight = jax.random.uniform(kw, (1, F), dtype=jnp.float32, minval=-0.5, maxval=0.5)
    bias = jax.random.uniform(kb, (1,), dtype=jnp.float32, minval=-0.5, maxval=0.5)

    # Small case (single 128-lane tile).
    y = logistic_regression(x, weight, bias)
    jax.block_until_ready(y)
    y_ref = jax.nn.sigmoid(x @ weight.T + bias)
    assert y.shape == (N, 1)
    assert jnp.allclose(y, y_ref, atol=1e-6), "small-N mismatch vs reference"

    # Larger ragged case: exercises multi-tile grid + padding path.
    N2 = 5000
    x2 = jax.random.normal(kx, (N2, F), dtype=jnp.float32)
    y2 = logistic_regression(x2, weight, bias, tile_n=1024)
    jax.block_until_ready(y2)
    y2_ref = jax.nn.sigmoid(x2 @ weight.T + bias)
    assert y2.shape == (N2, 1)
    assert jnp.allclose(y2, y2_ref, atol=1e-6), "tiled-N mismatch vs reference"

    print("KERNEL_OK")
</pallas_src>

<mosaic_0001>
module attributes {stable_mosaic.version = 11 : i64} {
  func.func @logreg_kernel(%arg0: i32, %arg1: memref<2x128xf32, #tpu.memory_space<vmem>>, %arg2: memref<2xf32, #tpu.memory_space<smem>>, %arg3: memref<1xf32, #tpu.memory_space<smem>>, %arg4: memref<1x128xf32, #tpu.memory_space<vmem>>) attributes {dimension_semantics = [#tpu.dimension_semantics<parallel>], iteration_bounds = array<i64: 1>, scalar_prefetch = 0 : i64, scratch_operands = 0 : i64, tpu.core_type = #tpu.core_type<tc>, window_params = [{transform_indices = @transform_0, window_bounds = array<i64: 2, 128>}, {transform_indices = @transform_1, window_bounds = array<i64: 2>}, {transform_indices = @transform_2, window_bounds = array<i64: 1>}, {transform_indices = @transform_3, window_bounds = array<i64: 1, 128>}]} {
    %c0 = arith.constant 0 : index
    %c0_0 = arith.constant 0 : index
    %0 = vector.load %arg1[%c0, %c0_0] : memref<2x128xf32, #tpu.memory_space<vmem>>, vector<2x128xf32>
    %1 = vector.extract_strided_slice %0 {offsets = [0, 0], sizes = [1, 128], strides = [1, 1]} : vector<2x128xf32> to vector<1x128xf32>
    %c0_1 = arith.constant 0 : index
    %2 = memref.load %arg2[%c0_1] : memref<2xf32, #tpu.memory_space<smem>>
    %3 = vector.broadcast %2 : f32 to vector<1x128xf32>
    %4 = arith.mulf %1, %3 : vector<1x128xf32>
    %5 = vector.extract_strided_slice %0 {offsets = [1, 0], sizes = [1, 128], strides = [1, 1]} : vector<2x128xf32> to vector<1x128xf32>
    %c1 = arith.constant 1 : index
    %6 = memref.load %arg2[%c1] : memref<2xf32, #tpu.memory_space<smem>>
    %7 = vector.broadcast %6 : f32 to vector<1x128xf32>
    %8 = arith.mulf %5, %7 : vector<1x128xf32>
    %9 = arith.addf %4, %8 : vector<1x128xf32>
    %c0_2 = arith.constant 0 : index
    %10 = memref.load %arg3[%c0_2] : memref<1xf32, #tpu.memory_space<smem>>
    %11 = vector.broadcast %10 : f32 to vector<1x128xf32>
    %12 = arith.addf %9, %11 : vector<1x128xf32>
    %13 = arith.negf %12 : vector<1x128xf32>
    %14 = math.exp %13 : vector<1x128xf32>
    %cst = arith.constant 1.000000e+00 : f32
    %15 = vector.broadcast %cst : f32 to vector<1x128xf32>
    %16 = arith.addf %15, %14 : vector<1x128xf32>
    %17 = arith.divf %15, %16 : vector<1x128xf32>
    %c0_3 = arith.constant 0 : index
    %c0_4 = arith.constant 0 : index
    %18 = vector.load %arg4[%c0_3, %c0_4] : memref<1x128xf32, #tpu.memory_space<vmem>>, vector<1x128xf32>
    tpu.vector_store %arg4[%c0_3, %c0_4], %17 {strides = array<i32>} : memref<1x128xf32, #tpu.memory_space<vmem>>, vector<1x128xf32>,
    return
  }
  func.func @transform_0(%arg0: i32) -> (i32, i32) {
    %c0_i32 = arith.constant 0 : i32
    %c0_i32_0 = arith.constant 0 : i32
    return %c0_i32, %arg0 : i32, i32
  }
  func.func @transform_1(%arg0: i32) -> i32 {
    %c0_i32 = arith.constant 0 : i32
    %c0_i32_0 = arith.constant 0 : i32
    return %c0_i32 : i32
  }
  func.func @transform_2(%arg0: i32) -> i32 {
    %c0_i32 = arith.constant 0 : i32
    %c0_i32_0 = arith.constant 0 : i32
    return %c0_i32 : i32
  }
  func.func @transform_3(%arg0: i32) -> (i32, i32) {
    %c0_i32 = arith.constant 0 : i32
    %c0_i32_0 = arith.constant 0 : i32
    return %c0_i32, %arg0 : i32, i32
  }
}

</mosaic_0001>

<bundles_post_ra>
// kernel: logistic_regression.1
= control target key start
LH: loop header
LB: loop body
LE: loop exit
PB: predicated region body
PF: predicated region fallthrough
CT: control target
= control target key end

     0   :  { %9 = vsyncpa [#allocation4], 0  ;;  %s108_s0 = inlined_call_operand.vmem [shape: f32[2,128], index: 0, kind: input, shape index: {}]   ;;  %s109_s1 = inlined_call_operand.vmem [shape: f32[2], index: 1, kind: input, shape index: {}]   ;;  %s110_s2 = inlined_call_operand.<no memory space> [shape: f32[1], index: 2, kind: input, shape index: {}]   ;;  %s111_s3 = inlined_call_operand.vmem [shape: f32[1,128], index: 3, kind: output, shape index: {}]  }
   0x1   :  { %s18_s14 = sshll.u32 %s109_s1, 4  ;;  %s19_s14 = int_to_ptr.vmem [resolvable:$true] %s18_s14 }
   0x2   :  { %s61_s15 = scalar_lea.vmem %s19_s14, 16  ;;  %p66_p1 = scmp.lt.s32.totalorder %s19_s14, %s19_s14 }
   0x3   :  { %p62_p0 = scmp.ne.s32.totalorder %s19_s14, %s61_s15  ;;  %p67_p2 = scmp.lt.s32.totalorder %s61_s15, %s61_s15 }
   0x5   :  { %p68_p3 = por %p67_p2, %p66_p1 }
   0x7   :  { %p69_p4 = pnand %p68_p3, %p62_p0 }
   0x9   :  { %72 = shalt.err (!%p69_p4)
}
   0xa   :  { %s75_s16 = smov [#allocation3]  }
   0xb   :  { %21 = dma.vmem_to_smem %s19_s14, 16, %s75_s16, [#allocation4]  }
   0xc   :  { %73 = dma.done.wait [#allocation4], 16  }
   0xd   :  { %74 = vsyncadd [#allocation4], 4294967280 }
   0xe   :  { %27 = sfence }
   0xf   :  { %s29_s17 = sld [smem:[#allocation3]]  ;;  %s54_s18 = sld [smem:[#allocation3 + $0x1]]  ;;  %v28_v0 = vld [vmem:[%s108_s0] sm:$0x3]  ;;  %v40_v6 = vstv %s110_s2 }
  0x15   :  { %v30_v1 = vstv %s29_s17  ;;  %v33_v2 = vstv %s54_s18 }
  0x16   :  { %v31_v3 = vmul.f32 %v30_v1, %v28_v0  ;;  %v34_v4 = vmul.f32 %v33_v2, %v28_v0 }
  0x18   :  { %v36_v5 = vrot.slane %v34_v4, 1 }
  0x1a   :  { %v38_v7 = vadd.f32 %v36_v5, %v31_v3 }
  0x1c   :  { %v41_v8 = vadd.f32 %v40_v6, %v38_v7 }
  0x1e   :  { %v55_v9 = vmul.f32 -1.442695, %v41_v8 }
  0x20   :  { %57 = vpow2.f32 %v55_v9 }
  0x2a   :  { %v58_v10 = vpop.eup %57 }
  0x2b   :  { %v45_v11 = vadd.f32 1.0, %v58_v10 }
  0x2d   :  { %59 = vrcp.f32 %v45_v11 }
  0x37   :  { %v60_v12 = vpop.eup %59 }
  0x38   :  { %48 = vst [vmem:[%s111_s3] sm:$0x1] %v60_v12 }
  0x39   :  { %53 = vsyncpa [#allocation4], 1 }

</bundles_post_ra>
